<compile_context>
chip_gen: v7x
topology: tpu7x:2x2x1
jax: 0.10.0
libtpu: 0.0.40
codegen_flags: <defaults>
</compile_context>

<pallas_src>
import functools

import jax
import jax.numpy as jnp
from jax.experimental import pallas as pl
from jax.experimental.pallas import tpu as pltpu

_MiB = 1024 * 1024
_LANE = 128


def _round_up(a, m):
    return -(-a // m) * m


def _vmem_capacity_bytes():
    """Physical VMEM per TensorCore; conservative fallback if query fails."""
    try:
        return int(pltpu.get_tpu_info().vmem_capacity_bytes)
    except Exception:
        return 64 * _MiB  # v7x per-core VMEM (smallest of the three gens)


def _default_block_bytes():
    # ~12 MiB on v5e/v6e (128 MiB VMEM), ~8 MiB on v7x (64 MiB VMEM).
    return min(12 * _MiB, _vmem_capacity_bytes() // 8)


def _choose_tiles(N, C, HW, itemsize, block_bytes):
    """Pick (bn, hw_blk): batch elements and spatial chunk per grid step."""
    sub = 8 * max(1, 4 // itemsize)          # sublane pack: 8 f32 / 16 bf16 / 32 i8
    c_pad = _round_up(C, sub)                # padded channel footprint in VMEM

    def slab(bn, hw):                        # VMEM bytes of one x block
        return bn * c_pad * _round_up(hw, _LANE) * itemsize

    # Legal batch blocks for the (bn, C) output tile: bn divides N and is a
    # multiple of 8 (sublane) or the full batch.
    legal = [d for d in range(1, N + 1) if N % d == 0 and (d % 8 == 0 or d == N)]
    multi = [d for d in legal if N // d >= 2]   # >= 2 batch blocks (v7x megacore)
    bn_min = min(legal)

    # Largest lane-multiple spatial chunk such that the smallest legal batch
    # block fits the budget (capped at the full spatial extent).
    hw_cap = _round_up(HW, _LANE)
    hw_blk = min(hw_cap,
                 max(_LANE,
                     (block_bytes // (bn_min * c_pad * itemsize)) // _LANE * _LANE))
    if hw_blk >= HW:
        hw_blk = HW                           # whole extent per step, no masking
    else:
        # Balance the chunks so the tail block is as full as possible.
        n_hw = -(-HW // hw_blk)
        hw_blk = _round_up(-(-HW // n_hw), _LANE)

    def pick(cands):
        fit = [d for d in cands if slab(d, hw_blk) <= block_bytes]
        return max(fit) if fit else None

    bn = pick(multi)          # prefer >= 2 parallel grid steps
    if bn is None:
        bn = pick(legal)      # else the largest legal block that fits
    if bn is None:
        bn = bn_min           # minimum legal block (hw_blk already shrunk)
    return bn, hw_blk


def _se_kernel(x_ref, w1t_ref, b1_ref, w2t_ref, b2_ref, o_ref, acc_ref,
               *, hw, hw_blk, inv_hw, mask_tail):
    # x_ref:   (bn, C, hw_blk)  bn batch elements, one spatial chunk
    # w1t_ref: (C, Cr)   b1_ref: (1, Cr)     compress weights (pre-transposed)
    # w2t_ref: (Cr, C)   b2_ref: (1, C)      excitation weights (pre-transposed)
    # o_ref:   (bn, C)   acc_ref: (bn, C) f32 running spatial sum
    k = pl.program_id(1)

    @pl.when(k == 0)
    def _init():
        acc_ref[...] = jnp.zeros_like(acc_ref)

    x = x_ref[...]
    if mask_tail:
        # Ragged spatial tail: zero out-of-range lanes of the last chunk.
        lane = jax.lax.broadcasted_iota(jnp.int32, x.shape, 2)
        x = jnp.where(lane + k * hw_blk < hw, x, 0)

    # Partial global-average-pool: lane reduction with an f32 accumulator
    # (no f32 materialization of the whole tile).
    acc_ref[...] += jnp.sum(x, axis=-1, dtype=jnp.float32)

    @pl.when(k == pl.num_programs(1) - 1)
    def _finish():
        pooled = acc_ref[...] * inv_hw                                  # (bn, C)
        # compress (1x1 conv) + relu
        h = jnp.dot(pooled, w1t_ref[...],
                    preferred_element_type=jnp.float32) + b1_ref[...]
        h = jnp.maximum(h, 0.0)                                         # (bn, Cr)
        # excitation (1x1 conv) + sigmoid
        z = jnp.dot(h, w2t_ref[...],
                    preferred_element_type=jnp.float32) + b2_ref[...]
        o_ref[...] = jax.nn.sigmoid(z).astype(o_ref.dtype)              # (bn, C)


def se_forward(x, w1, b1, w2, b2, *, block_bytes=None):
    """SE gate. x: (N, C, H, W) NCHW; w1: (Cr, C); b1: (Cr,); w2: (C, Cr);
    b2: (C,). Returns the sigmoid gate of shape (N, C, 1, 1) (gate only, as in
    the PyTorch module)."""
    N, C, H, W = x.shape
    Cr = w1.shape[0]
    HW = H * W
    inv_hw = 1.0 / float(HW)
    itemsize = jnp.dtype(x.dtype).itemsize

    if block_bytes is None:
        block_bytes = _default_block_bytes()

    bn, hw_blk = _choose_tiles(N, C, HW, itemsize, block_bytes)
    n_b = N // bn
    n_hw = pl.cdiv(HW, hw_blk)
    mask_tail = (HW % hw_blk) != 0

    # Collapsing trailing contiguous dims is free (no HBM traffic).
    x_flat = x.reshape(N, C, HW)

    # Tiny parameter tensors: pre-transpose / upcast once in the wrapper.
    w1t = jnp.transpose(w1).astype(jnp.float32)        # (C, Cr)
    w2t = jnp.transpose(w2).astype(jnp.float32)        # (Cr, C)
    b1_2d = b1.reshape(1, Cr).astype(jnp.float32)
    b2_2d = b2.reshape(1, C).astype(jnp.float32)

    # Gate dtype matches PyTorch promotion semantics (f32 for f32 params).
    out_dtype = jnp.promote_types(x.dtype, w1.dtype)

    # VMEM footprint -> vmem_limit_bytes (x double-buffered, weights single,
    # output double-buffered, plus the accumulator and headroom).
    sub_x = 8 * max(1, 4 // itemsize)

    def _pad2(r, c, isz, sub=8):
        return _round_up(r, sub) * _round_up(c, _LANE) * isz

    x_blk_bytes = bn * _round_up(C, sub_x) * _round_up(hw_blk, _LANE) * itemsize
    w_bytes = (_pad2(C, Cr, 4) + _pad2(1, Cr, 4) + _pad2(Cr, C, 4) + _pad2(1, C, 4))
    out_bytes = _pad2(bn, C, jnp.dtype(out_dtype).itemsize)
    acc_bytes = _pad2(bn, C, 4)
    vmem_need = 2 * x_blk_bytes + w_bytes + 2 * out_bytes + acc_bytes
    vmem_limit = int(min(max(32 * _MiB, vmem_need + 4 * _MiB), _vmem_capacity_bytes()))

    kernel = functools.partial(_se_kernel, hw=HW, hw_blk=hw_blk,
                               inv_hw=inv_hw, mask_tail=mask_tail)

    # Grid-invariant weights/biases: single-buffered to free VMEM for x tiles.
    const1 = dict(pipeline_mode=pl.Buffered(1))

    out = pl.pallas_call(
        kernel,
        out_shape=jax.ShapeDtypeStruct((N, C), out_dtype),
        grid_spec=pltpu.PrefetchScalarGridSpec(
            num_scalar_prefetch=0,
            grid=(n_b, n_hw),
            in_specs=[
                pl.BlockSpec((bn, C, hw_blk), lambda i, k: (i, 0, k)),
                pl.BlockSpec((C, Cr), lambda i, k: (0, 0), **const1),
                pl.BlockSpec((1, Cr), lambda i, k: (0, 0), **const1),
                pl.BlockSpec((Cr, C), lambda i, k: (0, 0), **const1),
                pl.BlockSpec((1, C), lambda i, k: (0, 0), **const1),
            ],
            out_specs=pl.BlockSpec((bn, C), lambda i, k: (i, 0)),
            scratch_shapes=[pltpu.VMEM((bn, C), jnp.float32)],
        ),
        compiler_params=pltpu.CompilerParams(
            # batch-block axis parallel (v7x megacore); HW reduction arbitrary.
            dimension_semantics=("parallel", "arbitrary"),
            vmem_limit_bytes=vmem_limit),
    )(x_flat, w1t, b1_2d, w2t, b2_2d)

    return out.reshape(N, C, 1, 1)


def se_reference(x, w1, b1, w2, b2):
    """Pure-JAX reference mirroring the PyTorch forward."""
    pooled = jnp.mean(x.astype(jnp.float32), axis=(2, 3))                 # (N, C)
    h = jnp.maximum(pooled @ w1.T.astype(jnp.float32)
                    + b1.astype(jnp.float32), 0.0)                        # (N, Cr)
    out = jax.nn.sigmoid(h @ w2.T.astype(jnp.float32)
                         + b2.astype(jnp.float32))                        # (N, C)
    return out.reshape(x.shape[0], x.shape[1], 1, 1)


if __name__ == "__main__":
    key = jax.random.PRNGKey(0)
    kx, k1, k2, k3, k4 = jax.random.split(key, 5)

    # SE(in_chnls=4, ratio=2): compress 4->2, excitation 2->4
    N, C, H, W = 2, 4, 16, 16
    Cr = C // 2
    x = jax.random.normal(kx, (N, C, H, W), dtype=jnp.float32)
    # Conv2d(C, Cr, 1) weight (Cr, C, 1, 1) -> (Cr, C); bias (Cr,)
    w1 = jax.random.normal(k1, (Cr, C), dtype=jnp.float32) * 0.5
    b1 = jax.random.normal(k2, (Cr,), dtype=jnp.float32) * 0.1
    # Conv2d(Cr, C, 1) weight (C, Cr, 1, 1) -> (C, Cr); bias (C,)
    w2 = jax.random.normal(k3, (C, Cr), dtype=jnp.float32) * 0.5
    b2 = jax.random.normal(k4, (C,), dtype=jnp.float32) * 0.1

    out = jax.block_until_ready(se_forward(x, w1, b1, w2, b2))
    ref = se_reference(x, w1, b1, w2, b2)
    assert out.shape == (N, C, 1, 1), out.shape
    assert jnp.allclose(out, ref, atol=1e-5, rtol=1e-5), "mismatch vs reference"

    # Second config: spatial extent not a lane multiple + tiny block budget to
    # exercise the multi-step reduction and the in-kernel ragged-tail masking.
    N2, C2, H2, W2 = 8, 8, 10, 20
    Cr2 = C2 // 2
    kx2, k5, k6, k7, k8 = jax.random.split(jax.random.PRNGKey(0), 5)
    x2 = jax.random.normal(kx2, (N2, C2, H2, W2), dtype=jnp.float32)
    w1b = jax.random.normal(k5, (Cr2, C2), dtype=jnp.float32) * 0.5
    b1b = jax.random.normal(k6, (Cr2,), dtype=jnp.float32) * 0.1
    w2b = jax.random.normal(k7, (C2, Cr2), dtype=jnp.float32) * 0.5
    b2b = jax.random.normal(k8, (C2,), dtype=jnp.float32) * 0.1

    out2 = jax.block_until_ready(
        se_forward(x2, w1b, b1b, w2b, b2b, block_bytes=32 * 1024))
    ref2 = se_reference(x2, w1b, b1b, w2b, b2b)
    assert out2.shape == (N2, C2, 1, 1), out2.shape
    assert jnp.allclose(out2, ref2, atol=1e-5, rtol=1e-5), "mismatch (masked path)"

    print("KERNEL_OK")
</pallas_src>

<mosaic_0001>
module attributes {stable_mosaic.version = 11 : i64} {
  func.func @_se_kernel(%arg0: i32, %arg1: i32, %arg2: memref<2x4x256xf32, #tpu.memory_space<vmem>>, %arg3: memref<4x2xf32, #tpu.memory_space<vmem>>, %arg4: memref<1x2xf32, #tpu.memory_space<vmem>>, %arg5: memref<2x4xf32, #tpu.memory_space<vmem>>, %arg6: memref<1x4xf32, #tpu.memory_space<vmem>>, %arg7: memref<2x4xf32, #tpu.memory_space<vmem>>, %arg8: memref<2x4xf32, #tpu.memory_space<vmem>>) attributes {dimension_semantics = [#tpu.dimension_semantics<parallel>, #tpu.dimension_semantics<arbitrary>], iteration_bounds = array<i64: 1, 1>, scalar_prefetch = 0 : i64, scratch_operands = 1 : i64, tpu.core_type = #tpu.core_type<tc>, window_params = [{transform_indices = @transform_0, window_bounds = array<i64: 2, 4, 256>}, {pipeline_mode = #tpu.pipeline_mode<synchronous>, transform_indices = @transform_1, window_bounds = array<i64: 4, 2>}, {pipeline_mode = #tpu.pipeline_mode<synchronous>, transform_indices = @transform_2, window_bounds = array<i64: 1, 2>}, {pipeline_mode = #tpu.pipeline_mode<synchronous>, transform_indices = @transform_3, window_bounds = array<i64: 2, 4>}, {pipeline_mode = #tpu.pipeline_mode<synchronous>, transform_indices = @transform_4, window_bounds = array<i64: 1, 4>}, {transform_indices = @transform_5, window_bounds = array<i64: 2, 4>}]} {
    %c0_i32 = arith.constant 0 : i32
    %0 = arith.cmpi eq, %arg1, %c0_i32 : i32
    %1 = arith.extui %0 : i1 to i32
    %c0_i32_0 = arith.constant 0 : i32
    %2 = arith.cmpi ne, %1, %c0_i32_0 : i32
    scf.if %2 {
      %cst_9 = arith.constant 0.000000e+00 : f32
      %11 = vector.broadcast %cst_9 : f32 to vector<2x4xf32>
      %c0_10 = arith.constant 0 : index
      %c0_11 = arith.constant 0 : index
      %12 = vector.load %arg8[%c0_10, %c0_11] : memref<2x4xf32, #tpu.memory_space<vmem>>, vector<2x4xf32>
      tpu.vector_store %arg8[%c0_10, %c0_11], %11 {strides = array<i32>} : memref<2x4xf32, #tpu.memory_space<vmem>>, vector<2x4xf32>,
    } else {
    }
    %c0 = arith.constant 0 : index
    %c0_1 = arith.constant 0 : index
    %c0_2 = arith.constant 0 : index
    %3 = vector.load %arg2[%c0, %c0_1, %c0_2] : memref<2x4x256xf32, #tpu.memory_space<vmem>>, vector<2x4x256xf32>
    %c0_3 = arith.constant 0 : index
    %c0_4 = arith.constant 0 : index
    %4 = vector.load %arg8[%c0_3, %c0_4] : memref<2x4xf32, #tpu.memory_space<vmem>>, vector<2x4xf32>
    %cst = arith.constant dense<0.000000e+00> : vector<2x4xf32>
    %5 = vector.multi_reduction <add>, %3, %cst [2] : vector<2x4x256xf32> to vector<2x4xf32>
    %6 = arith.addf %4, %5 : vector<2x4xf32>
    %c0_5 = arith.constant 0 : index
    %c0_6 = arith.constant 0 : index
    %7 = vector.load %arg8[%c0_5, %c0_6] : memref<2x4xf32, #tpu.memory_space<vmem>>, vector<2x4xf32>
    tpu.vector_store %arg8[%c0_5, %c0_6], %6 {strides = array<i32>} : memref<2x4xf32, #tpu.memory_space<vmem>>, vector<2x4xf32>,
    %c0_i32_7 = arith.constant 0 : i32
    %8 = arith.cmpi eq, %arg1, %c0_i32_7 : i32
    %9 = arith.extui %8 : i1 to i32
    %c0_i32_8 = arith.constant 0 : i32
    %10 = arith.cmpi ne, %9, %c0_i32_8 : i32
    scf.if %10 {
      %c0_9 = arith.constant 0 : index
      %c0_10 = arith.constant 0 : index
      %11 = vector.load %arg8[%c0_9, %c0_10] : memref<2x4xf32, #tpu.memory_space<vmem>>, vector<2x4xf32>
      %cst_11 = arith.constant 3.906250e-03 : f32
      %12 = vector.broadcast %cst_11 : f32 to vector<2x4xf32>
      %13 = arith.mulf %11, %12 : vector<2x4xf32>
      %c0_12 = arith.constant 0 : index
      %c0_13 = arith.constant 0 : index
      %14 = vector.load %arg3[%c0_12, %c0_13] : memref<4x2xf32, #tpu.memory_space<vmem>>, vector<4x2xf32>
      %cst_14 = arith.constant dense<0.000000e+00> : vector<2x2xf32>
      %15 = tpu.matmul %13, %14, %cst_14 {dimension_numbers = #tpu.dot_dimension_numbers<[1], [0], [0], [1], [0, 0, 1, 1], [], []>} : vector<2x4xf32>, vector<4x2xf32>, vector<2x2xf32> -> vector<2x2xf32>
      %c0_15 = arith.constant 0 : index
      %c0_16 = arith.constant 0 : index
      %16 = vector.load %arg4[%c0_15, %c0_16] : memref<1x2xf32, #tpu.memory_space<vmem>>, vector<1x2xf32>
      %17 = vector.broadcast %16 : vector<1x2xf32> to vector<2x2xf32>
      %18 = arith.addf %15, %17 : vector<2x2xf32>
      %cst_17 = arith.constant 0.000000e+00 : f32
      %19 = vector.broadcast %cst_17 : f32 to vector<2x2xf32>
      %20 = arith.maximumf %18, %19 : vector<2x2xf32>
      %c0_18 = arith.constant 0 : index
      %c0_19 = arith.constant 0 : index
      %21 = vector.load %arg5[%c0_18, %c0_19] : memref<2x4xf32, #tpu.memory_space<vmem>>, vector<2x4xf32>
      %cst_20 = arith.constant dense<0.000000e+00> : vector<2x4xf32>
      %22 = tpu.matmul %20, %21, %cst_20 {dimension_numbers = #tpu.dot_dimension_numbers<[1], [0], [0], [1], [0, 0, 1, 1], [], []>} : vector<2x2xf32>, vector<2x4xf32>, vector<2x4xf32> -> vector<2x4xf32>
      %c0_21 = arith.constant 0 : index
      %c0_22 = arith.constant 0 : index
      %23 = vector.load %arg6[%c0_21, %c0_22] : memref<1x4xf32, #tpu.memory_space<vmem>>, vector<1x4xf32>
      %24 = vector.broadcast %23 : vector<1x4xf32> to vector<2x4xf32>
      %25 = arith.addf %22, %24 : vector<2x4xf32>
      %26 = arith.negf %25 : vector<2x4xf32>
      %27 = math.exp %26 : vector<2x4xf32>
      %cst_23 = arith.constant 1.000000e+00 : f32
      %28 = vector.broadcast %cst_23 : f32 to vector<2x4xf32>
      %29 = arith.addf %28, %27 : vector<2x4xf32>
      %30 = arith.divf %28, %29 : vector<2x4xf32>
      %c0_24 = arith.constant 0 : index
      %c0_25 = arith.constant 0 : index
      %31 = vector.load %arg7[%c0_24, %c0_25] : memref<2x4xf32, #tpu.memory_space<vmem>>, vector<2x4xf32>
      tpu.vector_store %arg7[%c0_24, %c0_25], %30 {strides = array<i32>} : memref<2x4xf32, #tpu.memory_space<vmem>>, vector<2x4xf32>,
    } else {
    }
    return
  }
  func.func @transform_0(%arg0: i32, %arg1: i32) -> (i32, i32, i32) {
    %c0_i32 = arith.constant 0 : i32
    %c0_i32_0 = arith.constant 0 : i32
    return %arg0, %c0_i32, %arg1 : i32, i32, i32
  }
  func.func @transform_1(%arg0: i32, %arg1: i32) -> (i32, i32) {
    %c0_i32 = arith.constant 0 : i32
    %c0_i32_0 = arith.constant 0 : i32
    %c0_i32_1 = arith.constant 0 : i32
    return %c0_i32, %c0_i32_0 : i32, i32
  }
  func.func @transform_2(%arg0: i32, %arg1: i32) -> (i32, i32) {
    %c0_i32 = arith.constant 0 : i32
    %c0_i32_0 = arith.constant 0 : i32
    %c0_i32_1 = arith.constant 0 : i32
    return %c0_i32, %c0_i32_0 : i32, i32
  }
  func.func @transform_3(%arg0: i32, %arg1: i32) -> (i32, i32) {
    %c0_i32 = arith.constant 0 : i32
    %c0_i32_0 = arith.constant 0 : i32
    %c0_i32_1 = arith.constant 0 : i32
    return %c0_i32, %c0_i32_0 : i32, i32
  }
  func.func @transform_4(%arg0: i32, %arg1: i32) -> (i32, i32) {
    %c0_i32 = arith.constant 0 : i32
    %c0_i32_0 = arith.constant 0 : i32
    %c0_i32_1 = arith.constant 0 : i32
    return %c0_i32, %c0_i32_0 : i32, i32
  }
  func.func @transform_5(%arg0: i32, %arg1: i32) -> (i32, i32) {
    %c0_i32 = arith.constant 0 : i32
    %c0_i32_0 = arith.constant 0 : i32
    return %arg0, %c0_i32 : i32, i32
  }
}

</mosaic_0001>

<bundles_post_ra>
// kernel: tpu_custom_call.1
= control target key start
LH: loop header
LB: loop body
LE: loop exit
PB: predicated region body
PF: predicated region fallthrough
CT: control target
= control target key end

     0   :  { %10 = vsyncpa [#allocation4], 0  ;;  %s439_s0 = inlined_call_operand.hbm [shape: f32[2,4,256], index: 0, kind: input, shape index: {}]   ;;  %s440_s1 = inlined_call_operand.vmem [shape: f32[4,2], index: 1, kind: input, shape index: {}]   ;;  %s441_s2 = inlined_call_operand.vmem [shape: f32[1,2], index: 2, kind: input, shape index: {}]   ;;  %s442_s3 = inlined_call_operand.vmem [shape: f32[2,4], index: 3, kind: input, shape index: {}]   ;;  %s443_s4 = inlined_call_operand.vmem [shape: f32[1,4], index: 4, kind: input, shape index: {}]   ;;  %s444_s5 = inlined_call_operand.hbm [shape: f32[2,4], index: 5, kind: output, shape index: {}]  }
   0x1   :  { %11 = vsyncpa [#allocation5], 0  ;;  %s359_s18 = smov [#allocation3]   ;;  %s311_s22 = scalar_lea.hbm %s439_s0, 256 }
   0x2   :  { %s17_s19 = sshll.u32 %s359_s18, 4  ;;  %p312_p0 = scmp.ne.s32.totalorder %s439_s0, %s311_s22  ;;  %s18_s19 = int_to_ptr.vmem [resolvable:$true] %s17_s19 }
   0x3   :  { %p315_p1 = scmp.lt.u32.totalorder %s311_s22, %s439_s0 }
   0x5   :  { %p317_p2 = pnand %p315_p1, %p312_p0 }
   0x7   :  { %320 = shalt.err (!%p317_p2)
}
   0x8   :  { %s321_s27 = scalar_lea.vmem %s18_s19, 256  ;;  %p326_p4 = scmp.lt.s32.totalorder %s18_s19, %s18_s19 }
   0x9   :  { %p322_p3 = scmp.ne.s32.totalorder %s18_s19, %s321_s27  ;;  %p327_p5 = scmp.lt.s32.totalorder %s321_s27, %s321_s27 }
   0xb   :  { %p328_p6 = por %p327_p5, %p326_p4 }
   0xd   :  { %p329_p7 = pnand %p328_p6, %p322_p3 }
   0xf   :  { %332 = shalt.err (!%p329_p7)
}
  0x10   :  { %s360_s28 = smov 128   ;;  %s361_s29 = smov 8  }
  0x11   :  { %23 = dma.hbm_to_vmem [thread:$0]  %s439_s0, 256, %s18_s19, [#allocation4], %s360_s28, %s360_s28, %s361_s29  }
  0x12   :  { %355 = dma.done.wait [#allocation4], 256  }
  0x13   :  { %356 = vsyncadd [#allocation4], 4294967040  ;;  %vm50_vm0 = vcmask 1043456   ;;  %v41_v0 = vld [vmem:[#allocation3] sm:$0xff]  ;;  %v42_v1 = vld [vmem:[#allocation3 + $0x8] sm:$0xff]  ;;  %vm39_vm1 = vcmask 25600   ;;  %v63_v12 = vlaneseq }
  0x14   :  { %v46_v2 = vcombine.high %v41_v0, %v41_v0  ;;  %v51_v3 = vsel %vm50_vm0, %v41_v0, 0.0  ;;  %v47_v4 = vcombine.high %v42_v1, %v42_v1  ;;  %v56_v6 = vsel %vm50_vm0, %v42_v1, 0.0  ;;  %v84_v11 = vld [vmem:[%s440_s1] sm:$0xf] }
  0x15   :  { %v362_v10 = vmov 0.0   ;;  %vm363_vm2 = vmmov 0   ;;  %v64_v13 = vand.u32 127, %v63_v12  ;;  %v66_v14 = vshrl.u32 %v63_v12, 7  ;;  %v170_v25 = vld [vmem:[%s442_s3] sm:$0x3] }
  0x16   :  { %v52_v5 = vsel %vm50_vm0, %v46_v2, 0.0  ;;  %v57_v7 = vsel %vm50_vm0, %v47_v4, 0.0  ;;  %40 = vst.msk [vmem:[#allocation2] sm:$0x3] %vm39_vm1, %v362_v10  ;;  %289 = vmatprep.subr.mxu0 %v362_v10  ;;  %294 = vmatprep.subr.mxu1 %v362_v10  ;;  %vm73_vm3 = vcmask 1041409   ;;  %vm92_vm4 = vcmask 31744  }
  0x17   :  { %v53_v8 = vadd.f32 %v52_v5, %v51_v3  ;;  %v58_v9 = vadd.f32 %v57_v7, %v56_v6  ;;  %290 = vmatpush3.msk.msra.mxu0 %vm50_vm0, %v84_v11  ;;  %291 = vmatprep.mubr.msk.f32.mxu0 %vm363_vm2, %v362_v10  ;;  %v67_v16 = vsub.s32 %v64_v13, %v66_v14  ;;  %vm182_vm5 = vcmask 1041408   ;;  %v278_v26 = vld [vmem:[%s441_s2] ss:$0 sm:$0xff]  ;;  %s364_s3 = smov [#allocation6]  }
  0x18   :  { %296 = vmatprep.mubr.msk.f32.mxu1 %vm363_vm2, %v362_v10  ;;  %295 = vmatpush3.msk.msra.mxu1 %vm182_vm5, %v170_v25  ;;  %vm178_vm6 = vcmask 15360   ;;  %v281_v31 = vld [vmem:[%s443_s4] ss:$0 sm:$0xff]  ;;  %s269_s2 = sshll.u32 %s364_s3, 4  ;;  %s270_s2 = int_to_ptr.vmem [resolvable:$true] %s269_s2 }
  0x19   :  { %54 = vadd.xlane.f32.xlu0 %v53_v8  ;;  %s333_s13 = scalar_lea.vmem %s270_s2, 32  ;;  %p338_p9 = scmp.lt.s32.totalorder %s270_s2, %s270_s2 }
  0x1a   :  { %p334_p8 = scmp.ne.s32.totalorder %s270_s2, %s333_s13  ;;  %p339_p10 = scmp.lt.s32.totalorder %s333_s13, %s333_s13 }
  0x1c   :  { %p340_p11 = por %p339_p10, %p338_p9 }
  0x1d   :  { %59 = vadd.xlane.f32.xlu0 %v58_v9  ;;  %v43_v20 = vld [vmem:[#allocation2] sm:$0x3] }
  0x1e   :  { %p341_p12 = pnand %p340_p11, %p334_p8 }
  0xa6   :  { %v55_v15 = vpop.xlane.xlu0 %54 }
  0xa7   :  { %v68_v18 = vrot.slane %v55_v15, %v67_v16 }
  0xaa   :  { %v60_v17 = vpop.xlane.xlu0 %59 }
  0xab   :  { %v72_v19 = vrot.slane %v60_v17, %v67_v16 }
  0xad   :  { %v74_v21 = vsel %vm73_vm3, %v72_v19, %v68_v18 }
  0xae   :  { %v76_v22 = vadd.f32 %v74_v21, %v43_v20 }
  0xb0   :  { %78 = vst.msk [vmem:[#allocation2] sm:$0x3] %vm39_vm1, %v76_v22 }
  0xb7   :  { %v82_v23 = vld [vmem:[#allocation2] sm:$0x3] }
  0xb8   :  { %v83_v24 = vmul.f32 0.00390625, %v82_v23 }
  0xba   :  { %292 = vmatmul.mubr.msk.f32.vlgmr.msra.gmra.mrb[0].mxu0 %vm92_vm4, %v83_v24 }
 0x18d   :  { %v165_v27 = vpop.f32.mrb[0].mxu0 }
 0x18e   :  { %v166_v28 = vadd.f32 %v278_v26, %v165_v27  ;;  %v293_v29 = vpop.f32.mrb[1].mxu0 }
 0x190   :  { %v169_v30 = vmax.f32 %v166_v28, 0.0 }
 0x192   :  { %297 = vmatmul.mubr.msk.f32.vlgmr.msra.gmra.mrb[0].mxu1 %vm178_vm6, %v169_v30 }
 0x265   :  { %v252_v32 = vpop.f32.mrb[0].mxu1 }
 0x266   :  { %v253_v33 = vadd.f32 %v281_v31, %v252_v32  ;;  %v298_v34 = vpop.f32.mrb[1].mxu1 }
 0x268   :  { %v284_v35 = vmul.f32 -1.442695, %v253_v33 }
 0x26a   :  { %307 = vpow2.f32 %v284_v35 }
 0x274   :  { %v308_v36 = vpop.eup %307 }
 0x275   :  { %v259_v37 = vadd.f32 1.0, %v308_v36 }
 0x277   :  { %309 = vrcp.f32 %v259_v37 }
 0x281   :  { %v310_v38 = vpop.eup %309 }
 0x282   :  { %262 = vst.msk [vmem:[#allocation6] sm:$0x3] %vm39_vm1, %v310_v38 }
 0x283   :  { %344 = shalt.err (!%p341_p12)
}
 0x284   :  { %s345_s15 = scalar_lea.hbm %s444_s5, 32 }
 0x285   :  { %p346_p13 = scmp.ne.s32.totalorder %s444_s5, %s345_s15  ;;  %p349_p0 = scmp.lt.u32.totalorder %s345_s15, %s444_s5 }
 0x287   :  { %p351_p1 = pnand %p349_p0, %p346_p13 }
 0x289   :  { %354 = shalt.err (!%p351_p1)
}
 0x28a   :  { %272 = dma.vmem_to_hbm [thread:$0]  %s270_s2, 32, %s444_s5, [#allocation5]  }
 0x28b   :  { %357 = dma.done.wait [#allocation5], 32  }
 0x28c   :  { %358 = vsyncadd [#allocation5], 4294967264 }
 0x28d   :  { %276 = vsyncpa [#allocation4], 1 }
 0x28e   :  { %277 = vsyncpa [#allocation5], 1 }

</bundles_post_ra>
